<compile_context>
chip_gen: v7x
topology: tpu7x:2x2x1
jax: 0.10.0
libtpu: 0.0.40
codegen_flags: <defaults>
</compile_context>

<pallas_src>
import numpy as np
import jax
import jax.numpy as jnp
from jax import lax
from jax.experimental import pallas as pl
from jax.experimental.pallas import tpu as pltpu


# Network geometry implied by the PyTorch module (x.view(-1, 192) forces 30x45 input).
IN_H, IN_W = 30, 45
C1_OUT, C1_K, C1_S = 8, 6, 3          # conv1: 1 -> 8, k=6, s=3  -> (9, 14)
C2_OUT, C2_K, C2_S = 8, 3, 2          # conv2: 8 -> 8, k=3, s=2  -> (4, 6)
OH2, OW2 = 4, 6
N_POS = OH2 * OW2                      # 24 conv2 output positions per sample
RF, RS = 12, 6                         # composite receptive field / stride of conv1∘conv2
PATCH = RF * RF                        # 144 input pixels feeding one conv2 output position
H1_LOCAL = 9 * C1_OUT                  # 3x3 conv1 outputs x 8 channels = 72 per position
FC1_OUT = 128
MAX_BLOCK_M = 128                      # batch rows per grid step


# ----------------------------- Pallas kernel --------------------------------
def _qnet_kernel(px_ref, w1_ref, b1_ref, w2_ref, b2_ref,
                 wf1_ref, bf1_ref, wf2_ref, bf2_ref, o_ref):
    bm = px_ref.shape[0]

    # conv1 (dense per-receptive-field matmul) + ReLU: (bm*24, 144) @ (144, 72)
    px = px_ref[...].reshape(bm * N_POS, PATCH)
    h1 = jnp.dot(px, w1_ref[...], preferred_element_type=jnp.float32) + b1_ref[...]
    h1 = jnp.maximum(h1, 0.0)

    # conv2 + ReLU: (bm*24, 72) @ (72, 8)
    h2 = jnp.dot(h1, w2_ref[...], preferred_element_type=jnp.float32) + b2_ref[...]
    h2 = jnp.maximum(h2, 0.0)
    h2 = h2.reshape(bm, N_POS, C2_OUT)

    # fc1: accumulate the 24 spatial positions (avoids a lane-merging reshape to
    # (bm, 192)); the column permutation of fc1_w already matches this ordering.
    acc = jnp.zeros((bm, FC1_OUT), jnp.float32)
    for pos in range(N_POS):
        acc = acc + jnp.dot(h2[:, pos, :], wf1_ref[pos],
                            preferred_element_type=jnp.float32)
    h3 = jnp.maximum(acc + bf1_ref[...], 0.0)

    # fc2 (no ReLU)
    q = jnp.dot(h3, wf2_ref[...], preferred_element_type=jnp.float32) + bf2_ref[...]
    o_ref[...] = q.astype(o_ref.dtype)


# --------------------------- one-time weight prep ----------------------------
def prepare_params(params):
    """Convert PyTorch-layout params into kernel-ready operands (done once)."""
    c1w = np.asarray(params["conv1_w"], np.float32)            # (8, 1, 6, 6)
    c1b = np.asarray(params["conv1_b"], np.float32)
    c2w = np.asarray(params["conv2_w"], np.float32)            # (8, 8, 3, 3)
    c2b = np.asarray(params["conv2_b"], np.float32)
    f1w = np.asarray(params["fc1_w"], np.float32)               # (128, 192)
    f1b = np.asarray(params["fc1_b"], np.float32)
    f2w = np.asarray(params["fc2_w"], np.float32)               # (A, 128)
    f2b = np.asarray(params["fc2_b"], np.float32)

    # conv1 evaluated at the 3x3 grid of positions inside a 12x12 patch, as an
    # exact dense (144 -> 72) matrix (entries are conv1 weights or zero).
    # Column order = (local position p = pr*3+pc outer, out-channel co inner).
    w1e = np.zeros((PATCH, H1_LOCAL), np.float32)
    for pr in range(3):
        for pc in range(3):
            p = pr * 3 + pc
            for co in range(C1_OUT):
                for ki in range(C1_K):
                    for kj in range(C1_K):
                        di, dj = C1_S * pr + ki, C1_S * pc + kj
                        w1e[di * RF + dj, p * C1_OUT + co] = c1w[co, 0, ki, kj]
    b1e = np.tile(c1b, 9).reshape(1, H1_LOCAL)

    # conv2 as a (72 -> 8) GEMM; row order (kh*3+kw outer, in-channel inner)
    # matches w1e's column order.
    w2f = c2w.transpose(2, 3, 1, 0).reshape(9 * C1_OUT, C2_OUT)
    b2f = c2b.reshape(1, C2_OUT)

    # fc1: fold torch's NCHW flatten (x.view(-1, 192)) into the weight layout,
    # grouped per conv2 output position -> (24, 8, 128).
    wf1 = f1w.T.reshape(C2_OUT, OH2, OW2, FC1_OUT).transpose(1, 2, 0, 3)
    wf1 = wf1.reshape(N_POS, C2_OUT, FC1_OUT)
    bf1 = f1b.reshape(1, FC1_OUT)

    wf2 = f2w.T                                                 # (128, A)
    bf2 = f2b.reshape(1, -1)

    prepared = dict(w1=w1e, b1=b1e, w2=w2f, b2=b2f,
                    wf1=wf1, bf1=bf1, wf2=wf2, bf2=bf2)
    return {k: jnp.asarray(v) for k, v in prepared.items()}


# ------------------------------ fused forward --------------------------------
@jax.jit
def qnet_forward(prep, x_nchw):
    """Fused QNet forward: x (N, 1, 30, 45) f32 -> Q-values (N, n_actions)."""
    N = x_nchw.shape[0]
    n_actions = prep["wf2"].shape[1]

    # Single XLA op: per conv2 output position, the 12x12 (stride 6) composite
    # receptive field.  Pure data movement (identity-selection conv), exact.
    # TODO(synk): pull this patch extraction into the kernel once lane-strided
    # gathers are cleanly expressible in Mosaic; it carries no semantic FLOPs.
    patches = lax.conv_general_dilated_patches(
        x_nchw, filter_shape=(RF, RF), window_strides=(RS, RS), padding="VALID",
        dimension_numbers=("NCHW", "OIHW", "NHWC"),
        precision=lax.Precision.HIGHEST)                        # (N, 4, 6, 144)
    px = patches.reshape(N, N_POS, PATCH)

    bm = N if N <= MAX_BLOCK_M else MAX_BLOCK_M
    grid = (pl.cdiv(N, bm),)

    def full_spec(arr):
        nd = arr.ndim
        return pl.BlockSpec(arr.shape, lambda i, _nd=nd: (0,) * _nd)

    weight_names = ("w1", "b1", "w2", "b2", "wf1", "bf1", "wf2", "bf2")
    return pl.pallas_call(
        _qnet_kernel,
        out_shape=jax.ShapeDtypeStruct((N, n_actions), jnp.float32),
        grid=grid,
        in_specs=[pl.BlockSpec((bm, N_POS, PATCH), lambda i: (i, 0, 0))]
                 + [full_spec(prep[k]) for k in weight_names],
        out_specs=pl.BlockSpec((bm, n_actions), lambda i: (i, 0)),
        compiler_params=pltpu.CompilerParams(
            dimension_semantics=("parallel",)),
    )(px, *[prep[k] for k in weight_names])


# --------------------------- pure-JAX reference ------------------------------
def qnet_forward_ref(params, x_nchw):
    hp = lax.Precision.HIGHEST
    y = lax.conv_general_dilated(
        x_nchw, params["conv1_w"], (C1_S, C1_S), "VALID",
        dimension_numbers=("NCHW", "OIHW", "NCHW"), precision=hp)
    y = jax.nn.relu(y + params["conv1_b"].reshape(1, -1, 1, 1))
    y = lax.conv_general_dilated(
        y, params["conv2_w"], (C2_S, C2_S), "VALID",
        dimension_numbers=("NCHW", "OIHW", "NCHW"), precision=hp)
    y = jax.nn.relu(y + params["conv2_b"].reshape(1, -1, 1, 1))
    y = y.reshape(y.shape[0], -1)                               # torch .view(-1, 192)
    y = jax.nn.relu(jnp.dot(y, params["fc1_w"].T, precision=hp) + params["fc1_b"])
    return jnp.dot(y, params["fc2_w"].T, precision=hp) + params["fc2_b"]


def init_params(key, n_actions):
    ks = jax.random.split(key, 8)
    s = 0.05
    return {
        "conv1_w": s * jax.random.normal(ks[0], (8, 1, 6, 6), jnp.float32),
        "conv1_b": s * jax.random.normal(ks[1], (8,), jnp.float32),
        "conv2_w": s * jax.random.normal(ks[2], (8, 8, 3, 3), jnp.float32),
        "conv2_b": s * jax.random.normal(ks[3], (8,), jnp.float32),
        "fc1_w":   s * jax.random.normal(ks[4], (128, 192), jnp.float32),
        "fc1_b":   s * jax.random.normal(ks[5], (128,), jnp.float32),
        "fc2_w":   s * jax.random.normal(ks[6], (n_actions, 128), jnp.float32),
        "fc2_b":   s * jax.random.normal(ks[7], (n_actions,), jnp.float32),
    }


if __name__ == "__main__":
    key = jax.random.PRNGKey(0)
    k_param, k_x = jax.random.split(key)

    batch, n_actions = 2, 8
    params = init_params(k_param, n_actions)
    prep = prepare_params(params)                 # one-time weight repack
    x = jax.random.uniform(k_x, (batch, 1, IN_H, IN_W), jnp.float32)

    q = jax.block_until_ready(qnet_forward(prep, x))
    q_ref = jax.block_until_ready(qnet_forward_ref(params, x))

    assert q.shape == (batch, n_actions), q.shape
    assert jnp.allclose(q, q_ref, atol=1e-4, rtol=1e-4), \
        float(jnp.max(jnp.abs(q - q_ref)))
    print("KERNEL_OK")
</pallas_src>

<mosaic_0001>
module attributes {stable_mosaic.version = 11 : i64} {
  func.func @_qnet_kernel(%arg0: i32, %arg1: memref<2x24x144xf32, #tpu.memory_space<vmem>>, %arg2: memref<144x72xf32, #tpu.memory_space<vmem>>, %arg3: memref<1x72xf32, #tpu.memory_space<vmem>>, %arg4: memref<72x8xf32, #tpu.memory_space<vmem>>, %arg5: memref<1x8xf32, #tpu.memory_space<vmem>>, %arg6: memref<24x8x128xf32, #tpu.memory_space<vmem>>, %arg7: memref<1x128xf32, #tpu.memory_space<vmem>>, %arg8: memref<128x8xf32, #tpu.memory_space<vmem>>, %arg9: memref<1x8xf32, #tpu.memory_space<vmem>>, %arg10: memref<2x8xf32, #tpu.memory_space<vmem>>) attributes {dimension_semantics = [#tpu.dimension_semantics<parallel>], iteration_bounds = array<i64: 1>, scalar_prefetch = 0 : i64, scratch_operands = 0 : i64, tpu.core_type = #tpu.core_type<tc>, window_params = [{transform_indices = @transform_0, window_bounds = array<i64: 2, 24, 144>}, {pipeline_mode = #tpu.pipeline_mode<synchronous>, transform_indices = @transform_1, window_bounds = array<i64: 144, 72>}, {pipeline_mode = #tpu.pipeline_mode<synchronous>, transform_indices = @transform_2, window_bounds = array<i64: 1, 72>}, {pipeline_mode = #tpu.pipeline_mode<synchronous>, transform_indices = @transform_3, window_bounds = array<i64: 72, 8>}, {pipeline_mode = #tpu.pipeline_mode<synchronous>, transform_indices = @transform_4, window_bounds = array<i64: 1, 8>}, {pipeline_mode = #tpu.pipeline_mode<synchronous>, transform_indices = @transform_5, window_bounds = array<i64: 24, 8, 128>}, {pipeline_mode = #tpu.pipeline_mode<synchronous>, transform_indices = @transform_6, window_bounds = array<i64: 1, 128>}, {pipeline_mode = #tpu.pipeline_mode<synchronous>, transform_indices = @transform_7, window_bounds = array<i64: 128, 8>}, {pipeline_mode = #tpu.pipeline_mode<synchronous>, transform_indices = @transform_8, window_bounds = array<i64: 1, 8>}, {transform_indices = @transform_9, window_bounds = array<i64: 2, 8>}]} {
    %c0 = arith.constant 0 : index
    %c0_0 = arith.constant 0 : index
    %c0_1 = arith.constant 0 : index
    %0 = vector.load %arg1[%c0, %c0_0, %c0_1] : memref<2x24x144xf32, #tpu.memory_space<vmem>>, vector<2x24x144xf32>
    %1 = vector.shape_cast %0 : vector<2x24x144xf32> to vector<48x144xf32>
    %c0_2 = arith.constant 0 : index
    %c0_3 = arith.constant 0 : index
    %2 = vector.load %arg2[%c0_2, %c0_3] : memref<144x72xf32, #tpu.memory_space<vmem>>, vector<144x72xf32>
    %cst = arith.constant dense<0.000000e+00> : vector<48x72xf32>
    %3 = tpu.matmul %1, %2, %cst {dimension_numbers = #tpu.dot_dimension_numbers<[1], [0], [0], [1], [0, 0, 1, 1], [], []>} : vector<48x144xf32>, vector<144x72xf32>, vector<48x72xf32> -> vector<48x72xf32>
    %c0_4 = arith.constant 0 : index
    %c0_5 = arith.constant 0 : index
    %4 = vector.load %arg3[%c0_4, %c0_5] : memref<1x72xf32, #tpu.memory_space<vmem>>, vector<1x72xf32>
    %5 = vector.broadcast %4 : vector<1x72xf32> to vector<48x72xf32>
    %6 = arith.addf %3, %5 : vector<48x72xf32>
    %cst_6 = arith.constant 0.000000e+00 : f32
    %7 = vector.broadcast %cst_6 : f32 to vector<48x72xf32>
    %8 = arith.maximumf %6, %7 : vector<48x72xf32>
    %c0_7 = arith.constant 0 : index
    %c0_8 = arith.constant 0 : index
    %9 = vector.load %arg4[%c0_7, %c0_8] : memref<72x8xf32, #tpu.memory_space<vmem>>, vector<72x8xf32>
    %cst_9 = arith.constant dense<0.000000e+00> : vector<48x8xf32>
    %10 = tpu.matmul %8, %9, %cst_9 {dimension_numbers = #tpu.dot_dimension_numbers<[1], [0], [0], [1], [0, 0, 1, 1], [], []>} : vector<48x72xf32>, vector<72x8xf32>, vector<48x8xf32> -> vector<48x8xf32>
    %c0_10 = arith.constant 0 : index
    %c0_11 = arith.constant 0 : index
    %11 = vector.load %arg5[%c0_10, %c0_11] : memref<1x8xf32, #tpu.memory_space<vmem>>, vector<1x8xf32>
    %12 = vector.broadcast %11 : vector<1x8xf32> to vector<48x8xf32>
    %13 = arith.addf %10, %12 : vector<48x8xf32>
    %cst_12 = arith.constant 0.000000e+00 : f32
    %14 = vector.broadcast %cst_12 : f32 to vector<48x8xf32>
    %15 = arith.maximumf %13, %14 : vector<48x8xf32>
    %16 = vector.shape_cast %15 : vector<48x8xf32> to vector<2x24x8xf32>
    %cst_13 = arith.constant 0.000000e+00 : f32
    %17 = vector.broadcast %cst_13 : f32 to vector<2x128xf32>
    %18 = vector.extract_strided_slice %16 {offsets = [0, 0, 0], sizes = [2, 1, 8], strides = [1, 1, 1]} : vector<2x24x8xf32> to vector<2x1x8xf32>
    %19 = vector.shape_cast %18 : vector<2x1x8xf32> to vector<2x8xf32>
    %c0_14 = arith.constant 0 : index
    %c0_15 = arith.constant 0 : index
    %c0_16 = arith.constant 0 : index
    %20 = vector.load %arg6[%c0_14, %c0_15, %c0_16] : memref<24x8x128xf32, #tpu.memory_space<vmem>>, vector<1x8x128xf32>
    %21 = vector.shape_cast %20 : vector<1x8x128xf32> to vector<8x128xf32>
    %cst_17 = arith.constant dense<0.000000e+00> : vector<2x128xf32>
    %22 = tpu.matmul %19, %21, %cst_17 {dimension_numbers = #tpu.dot_dimension_numbers<[1], [0], [0], [1], [0, 0, 1, 1], [], []>} : vector<2x8xf32>, vector<8x128xf32>, vector<2x128xf32> -> vector<2x128xf32>
    %23 = arith.addf %17, %22 : vector<2x128xf32>
    %24 = vector.extract_strided_slice %16 {offsets = [0, 1, 0], sizes = [2, 1, 8], strides = [1, 1, 1]} : vector<2x24x8xf32> to vector<2x1x8xf32>
    %25 = vector.shape_cast %24 : vector<2x1x8xf32> to vector<2x8xf32>
    %c1 = arith.constant 1 : index
    %c0_18 = arith.constant 0 : index
    %c0_19 = arith.constant 0 : index
    %26 = vector.load %arg6[%c1, %c0_18, %c0_19] : memref<24x8x128xf32, #tpu.memory_space<vmem>>, vector<1x8x128xf32>
    %27 = vector.shape_cast %26 : vector<1x8x128xf32> to vector<8x128xf32>
    %cst_20 = arith.constant dense<0.000000e+00> : vector<2x128xf32>
    %28 = tpu.matmul %25, %27, %cst_20 {dimension_numbers = #tpu.dot_dimension_numbers<[1], [0], [0], [1], [0, 0, 1, 1], [], []>} : vector<2x8xf32>, vector<8x128xf32>, vector<2x128xf32> -> vector<2x128xf32>
    %29 = arith.addf %23, %28 : vector<2x128xf32>
    %30 = vector.extract_strided_slice %16 {offsets = [0, 2, 0], sizes = [2, 1, 8], strides = [1, 1, 1]} : vector<2x24x8xf32> to vector<2x1x8xf32>
    %31 = vector.shape_cast %30 : vector<2x1x8xf32> to vector<2x8xf32>
    %c2 = arith.constant 2 : index
    %c0_21 = arith.constant 0 : index
    %c0_22 = arith.constant 0 : index
    %32 = vector.load %arg6[%c2, %c0_21, %c0_22] : memref<24x8x128xf32, #tpu.memory_space<vmem>>, vector<1x8x128xf32>
    %33 = vector.shape_cast %32 : vector<1x8x128xf32> to vector<8x128xf32>
    %cst_23 = arith.constant dense<0.000000e+00> : vector<2x128xf32>
    %34 = tpu.matmul %31, %33, %cst_23 {dimension_numbers = #tpu.dot_dimension_numbers<[1], [0], [0], [1], [0, 0, 1, 1], [], []>} : vector<2x8xf32>, vector<8x128xf32>, vector<2x128xf32> -> vector<2x128xf32>
    %35 = arith.addf %29, %34 : vector<2x128xf32>
    %36 = vector.extract_strided_slice %16 {offsets = [0, 3, 0], sizes = [2, 1, 8], strides = [1, 1, 1]} : vector<2x24x8xf32> to vector<2x1x8xf32>
    %37 = vector.shape_cast %36 : vector<2x1x8xf32> to vector<2x8xf32>
    %c3 = arith.constant 3 : index
    %c0_24 = arith.constant 0 : index
    %c0_25 = arith.constant 0 : index
    %38 = vector.load %arg6[%c3, %c0_24, %c0_25] : memref<24x8x128xf32, #tpu.memory_space<vmem>>, vector<1x8x128xf32>
    %39 = vector.shape_cast %38 : vector<1x8x128xf32> to vector<8x128xf32>
    %cst_26 = arith.constant dense<0.000000e+00> : vector<2x128xf32>
    %40 = tpu.matmul %37, %39, %cst_26 {dimension_numbers = #tpu.dot_dimension_numbers<[1], [0], [0], [1], [0, 0, 1, 1], [], []>} : vector<2x8xf32>, vector<8x128xf32>, vector<2x128xf32> -> vector<2x128xf32>
    %41 = arith.addf %35, %40 : vector<2x128xf32>
    %42 = vector.extract_strided_slice %16 {offsets = [0, 4, 0], sizes = [2, 1, 8], strides = [1, 1, 1]} : vector<2x24x8xf32> to vector<2x1x8xf32>
    %43 = vector.shape_cast %42 : vector<2x1x8xf32> to vector<2x8xf32>
    %c4 = arith.constant 4 : index
    %c0_27 = arith.constant 0 : index
    %c0_28 = arith.constant 0 : index
    %44 = vector.load %arg6[%c4, %c0_27, %c0_28] : memref<24x8x128xf32, #tpu.memory_space<vmem>>, vector<1x8x128xf32>
    %45 = vector.shape_cast %44 : vector<1x8x128xf32> to vector<8x128xf32>
    %cst_29 = arith.constant dense<0.000000e+00> : vector<2x128xf32>
    %46 = tpu.matmul %43, %45, %cst_29 {dimension_numbers = #tpu.dot_dimension_numbers<[1], [0], [0], [1], [0, 0, 1, 1], [], []>} : vector<2x8xf32>, vector<8x128xf32>, vector<2x128xf32> -> vector<2x128xf32>
    %47 = arith.addf %41, %46 : vector<2x128xf32>
    %48 = vector.extract_strided_slice %16 {offsets = [0, 5, 0], sizes = [2, 1, 8], strides = [1, 1, 1]} : vector<2x24x8xf32> to vector<2x1x8xf32>
    %49 = vector.shape_cast %48 : vector<2x1x8xf32> to vector<2x8xf32>
    %c5 = arith.constant 5 : index
    %c0_30 = arith.constant 0 : index
    %c0_31 = arith.constant 0 : index
    %50 = vector.load %arg6[%c5, %c0_30, %c0_31] : memref<24x8x128xf32, #tpu.memory_space<vmem>>, vector<1x8x128xf32>
    %51 = vector.shape_cast %50 : vector<1x8x128xf32> to vector<8x128xf32>
    %cst_32 = arith.constant dense<0.000000e+00> : vector<2x128xf32>
    %52 = tpu.matmul %49, %51, %cst_32 {dimension_numbers = #tpu.dot_dimension_numbers<[1], [0], [0], [1], [0, 0, 1, 1], [], []>} : vector<2x8xf32>, vector<8x128xf32>, vector<2x128xf32> -> vector<2x128xf32>
    %53 = arith.addf %47, %52 : vector<2x128xf32>
    %54 = vector.extract_strided_slice %16 {offsets = [0, 6, 0], sizes = [2, 1, 8], strides = [1, 1, 1]} : vector<2x24x8xf32> to vector<2x1x8xf32>
    %55 = vector.shape_cast %54 : vector<2x1x8xf32> to vector<2x8xf32>
    %c6 = arith.constant 6 : index
    %c0_33 = arith.constant 0 : index
    %c0_34 = arith.constant 0 : index
    %56 = vector.load %arg6[%c6, %c0_33, %c0_34] : memref<24x8x128xf32, #tpu.memory_space<vmem>>, vector<1x8x128xf32>
    %57 = vector.shape_cast %56 : vector<1x8x128xf32> to vector<8x128xf32>
    %cst_35 = arith.constant dense<0.000000e+00> : vector<2x128xf32>
    %58 = tpu.matmul %55, %57, %cst_35 {dimension_numbers = #tpu.dot_dimension_numbers<[1], [0], [0], [1], [0, 0, 1, 1], [], []>} : vector<2x8xf32>, vector<8x128xf32>, vector<2x128xf32> -> vector<2x128xf32>
    %59 = arith.addf %53, %58 : vector<2x128xf32>
    %60 = vector.extract_strided_slice %16 {offsets = [0, 7, 0], sizes = [2, 1, 8], strides = [1, 1, 1]} : vector<2x24x8xf32> to vector<2x1x8xf32>
    %61 = vector.shape_cast %60 : vector<2x1x8xf32> to vector<2x8xf32>
    %c7 = arith.constant 7 : index
    %c0_36 = arith.constant 0 : index
    %c0_37 = arith.constant 0 : index
    %62 = vector.load %arg6[%c7, %c0_36, %c0_37] : memref<24x8x128xf32, #tpu.memory_space<vmem>>, vector<1x8x128xf32>
    %63 = vector.shape_cast %62 : vector<1x8x128xf32> to vector<8x128xf32>
    %cst_38 = arith.constant dense<0.000000e+00> : vector<2x128xf32>
    %64 = tpu.matmul %61, %63, %cst_38 {dimension_numbers = #tpu.dot_dimension_numbers<[1], [0], [0], [1], [0, 0, 1, 1], [], []>} : vector<2x8xf32>, vector<8x128xf32>, vector<2x128xf32> -> vector<2x128xf32>
    %65 = arith.addf %59, %64 : vector<2x128xf32>
    %66 = vector.extract_strided_slice %16 {offsets = [0, 8, 0], sizes = [2, 1, 8], strides = [1, 1, 1]} : vector<2x24x8xf32> to vector<2x1x8xf32>
    %67 = vector.shape_cast %66 : vector<2x1x8xf32> to vector<2x8xf32>
    %c8 = arith.constant 8 : index
    %c0_39 = arith.constant 0 : index
    %c0_40 = arith.constant 0 : index
    %68 = vector.load %arg6[%c8, %c0_39, %c0_40] : memref<24x8x128xf32, #tpu.memory_space<vmem>>, vector<1x8x128xf32>
    %69 = vector.shape_cast %68 : vector<1x8x128xf32> to vector<8x128xf32>
    %cst_41 = arith.constant dense<0.000000e+00> : vector<2x128xf32>
    %70 = tpu.matmul %67, %69, %cst_41 {dimension_numbers = #tpu.dot_dimension_numbers<[1], [0], [0], [1], [0, 0, 1, 1], [], []>} : vector<2x8xf32>, vector<8x128xf32>, vector<2x128xf32> -> vector<2x128xf32>
    %71 = arith.addf %65, %70 : vector<2x128xf32>
    %72 = vector.extract_strided_slice %16 {offsets = [0, 9, 0], sizes = [2, 1, 8], strides = [1, 1, 1]} : vector<2x24x8xf32> to vector<2x1x8xf32>
    %73 = vector.shape_cast %72 : vector<2x1x8xf32> to vector<2x8xf32>
    %c9 = arith.constant 9 : index
    %c0_42 = arith.constant 0 : index
    %c0_43 = arith.constant 0 : index
    %74 = vector.load %arg6[%c9, %c0_42, %c0_43] : memref<24x8x128xf32, #tpu.memory_space<vmem>>, vector<1x8x128xf32>
    %75 = vector.shape_cast %74 : vector<1x8x128xf32> to vector<8x128xf32>
    %cst_44 = arith.constant dense<0.000000e+00> : vector<2x128xf32>
    %76 = tpu.matmul %73, %75, %cst_44 {dimension_numbers = #tpu.dot_dimension_numbers<[1], [0], [0], [1], [0, 0, 1, 1], [], []>} : vector<2x8xf32>, vector<8x128xf32>, vector<2x128xf32> -> vector<2x128xf32>
    %77 = arith.addf %71, %76 : vector<2x128xf32>
    %78 = vector.extract_strided_slice %16 {offsets = [0, 10, 0], sizes = [2, 1, 8], strides = [1, 1, 1]} : vector<2x24x8xf32> to vector<2x1x8xf32>
    %79 = vector.shape_cast %78 : vector<2x1x8xf32> to vector<2x8xf32>
    %c10 = arith.constant 10 : index
    %c0_45 = arith.constant 0 : index
    %c0_46 = arith.constant 0 : index
    %80 = vector.load %arg6[%c10, %c0_45, %c0_46] : memref<24x8x128xf32, #tpu.memory_space<vmem>>, vector<1x8x128xf32>
    %81 = vector.shape_cast %80 : vector<1x8x128xf32> to vector<8x128xf32>
    %cst_47 = arith.constant dense<0.000000e+00> : vector<2x128xf32>
    %82 = tpu.matmul %79, %81, %cst_47 {dimension_numbers = #tpu.dot_dimension_numbers<[1], [0], [0], [1], [0, 0, 1, 1], [], []>} : vector<2x8xf32>, vector<8x128xf32>, vector<2x128xf32> -> vector<2x128xf32>
    %83 = arith.addf %77, %82 : vector<2x128xf32>
    %84 = vector.extract_strided_slice %16 {offsets = [0, 11, 0], sizes = [2, 1, 8], strides = [1, 1, 1]} : vector<2x24x8xf32> to vector<2x1x8xf32>
    %85 = vector.shape_cast %84 : vector<2x1x8xf32> to vector<2x8xf32>
    %c11 = arith.constant 11 : index
    %c0_48 = arith.constant 0 : index
    %c0_49 = arith.constant 0 : index
    %86 = vector.load %arg6[%c11, %c0_48, %c0_49] : memref<24x8x128xf32, #tpu.memory_space<vmem>>, vector<1x8x128xf32>
    %87 = vector.shape_cast %86 : vector<1x8x128xf32> to vector<8x128xf32>
    %cst_50 = arith.constant dense<0.000000e+00> : vector<2x128xf32>
    %88 = tpu.matmul %85, %87, %cst_50 {dimension_numbers = #tpu.dot_dimension_numbers<[1], [0], [0], [1], [0, 0, 1, 1], [], []>} : vector<2x8xf32>, vector<8x128xf32>, vector<2x128xf32> -> vector<2x128xf32>
    %89 = arith.addf %83, %88 : vector<2x128xf32>
    %90 = vector.extract_strided_slice %16 {offsets = [0, 12, 0], sizes = [2, 1, 8], strides = [1, 1, 1]} : vector<2x24x8xf32> to vector<2x1x8xf32>
    %91 = vector.shape_cast %90 : vector<2x1x8xf32> to vector<2x8xf32>
    %c12 = arith.constant 12 : index
    %c0_51 = arith.constant 0 : index
    %c0_52 = arith.constant 0 : index
    %92 = vector.load %arg6[%c12, %c0_51, %c0_52] : memref<24x8x128xf32, #tpu.memory_space<vmem>>, vector<1x8x128xf32>
    %93 = vector.shape_cast %92 : vector<1x8x128xf32> to vector<8x128xf32>
    %cst_53 = arith.constant dense<0.000000e+00> : vector<2x128xf32>
    %94 = tpu.matmul %91, %93, %cst_53 {dimension_numbers = #tpu.dot_dimension_numbers<[1], [0], [0], [1], [0, 0, 1, 1], [], []>} : vector<2x8xf32>, vector<8x128xf32>, vector<2x128xf32> -> vector<2x128xf32>
    %95 = arith.addf %89, %94 : vector<2x128xf32>
    %96 = vector.extract_strided_slice %16 {offsets = [0, 13, 0], sizes = [2, 1, 8], strides = [1, 1, 1]} : vector<2x24x8xf32> to vector<2x1x8xf32>
    %97 = vector.shape_cast %96 : vector<2x1x8xf32> to vector<2x8xf32>
    %c13 = arith.constant 13 : index
    %c0_54 = arith.constant 0 : index
    %c0_55 = arith.constant 0 : index
    %98 = vector.load %arg6[%c13, %c0_54, %c0_55] : memref<24x8x128xf32, #tpu.memory_space<vmem>>, vector<1x8x128xf32>
    %99 = vector.shape_cast %98 : vector<1x8x128xf32> to vector<8x128xf32>
    %cst_56 = arith.constant dense<0.000000e+00> : vector<2x128xf32>
    %100 = tpu.matmul %97, %99, %cst_56 {dimension_numbers = #tpu.dot_dimension_numbers<[1], [0], [0], [1], [0, 0, 1, 1], [], []>} : vector<2x8xf32>, vector<8x128xf32>, vector<2x128xf32> -> vector<2x128xf32>
    %101 = arith.addf %95, %100 : vector<2x128xf32>
    %102 = vector.extract_strided_slice %16 {offsets = [0, 14, 0], sizes = [2, 1, 8], strides = [1, 1, 1]} : vector<2x24x8xf32> to vector<2x1x8xf32>
    %103 = vector.shape_cast %102 : vector<2x1x8xf32> to vector<2x8xf32>
    %c14 = arith.constant 14 : index
    %c0_57 = arith.constant 0 : index
    %c0_58 = arith.constant 0 : index
    %104 = vector.load %arg6[%c14, %c0_57, %c0_58] : memref<24x8x128xf32, #tpu.memory_space<vmem>>, vector<1x8x128xf32>
    %105 = vector.shape_cast %104 : vector<1x8x128xf32> to vector<8x128xf32>
    %cst_59 = arith.constant dense<0.000000e+00> : vector<2x128xf32>
    %106 = tpu.matmul %103, %105, %cst_59 {dimension_numbers = #tpu.dot_dimension_numbers<[1], [0], [0], [1], [0, 0, 1, 1], [], []>} : vector<2x8xf32>, vector<8x128xf32>, vector<2x128xf32> -> vector<2x128xf32>
    %107 = arith.addf %101, %106 : vector<2x128xf32>
    %108 = vector.extract_strided_slice %16 {offsets = [0, 15, 0], sizes = [2, 1, 8], strides = [1, 1, 1]} : vector<2x24x8xf32> to vector<2x1x8xf32>
    %109 = vector.shape_cast %108 : vector<2x1x8xf32> to vector<2x8xf32>
    %c15 = arith.constant 15 : index
    %c0_60 = arith.constant 0 : index
    %c0_61 = arith.constant 0 : index
    %110 = vector.load %arg6[%c15, %c0_60, %c0_61] : memref<24x8x128xf32, #tpu.memory_space<vmem>>, vector<1x8x128xf32>
    %111 = vector.shape_cast %110 : vector<1x8x128xf32> to vector<8x128xf32>
    %cst_62 = arith.constant dense<0.000000e+00> : vector<2x128xf32>
    %112 = tpu.matmul %109, %111, %cst_62 {dimension_numbers = #tpu.dot_dimension_numbers<[1], [0], [0], [1], [0, 0, 1, 1], [], []>} : vector<2x8xf32>, vector<8x128xf32>, vector<2x128xf32> -> vector<2x128xf32>
    %113 = arith.addf %107, %112 : vector<2x128xf32>
    %114 = vector.extract_strided_slice %16 {offsets = [0, 16, 0], sizes = [2, 1, 8], strides = [1, 1, 1]} : vector<2x24x8xf32> to vector<2x1x8xf32>
    %115 = vector.shape_cast %114 : vector<2x1x8xf32> to vector<2x8xf32>
    %c16 = arith.constant 16 : index
    %c0_63 = arith.constant 0 : index
    %c0_64 = arith.constant 0 : index
    %116 = vector.load %arg6[%c16, %c0_63, %c0_64] : memref<24x8x128xf32, #tpu.memory_space<vmem>>, vector<1x8x128xf32>
    %117 = vector.shape_cast %116 : vector<1x8x128xf32> to vector<8x128xf32>
    %cst_65 = arith.constant dense<0.000000e+00> : vector<2x128xf32>
    %118 = tpu.matmul %115, %117, %cst_65 {dimension_numbers = #tpu.dot_dimension_numbers<[1], [0], [0], [1], [0, 0, 1, 1], [], []>} : vector<2x8xf32>, vector<8x128xf32>, vector<2x128xf32> -> vector<2x128xf32>
    %119 = arith.addf %113, %118 : vector<2x128xf32>
    %120 = vector.extract_strided_slice %16 {offsets = [0, 17, 0], sizes = [2, 1, 8], strides = [1, 1, 1]} : vector<2x24x8xf32> to vector<2x1x8xf32>
    %121 = vector.shape_cast %120 : vector<2x1x8xf32> to vector<2x8xf32>
    %c17 = arith.constant 17 : index
    %c0_66 = arith.constant 0 : index
    %c0_67 = arith.constant 0 : index
    %122 = vector.load %arg6[%c17, %c0_66, %c0_67] : memref<24x8x128xf32, #tpu.memory_space<vmem>>, vector<1x8x128xf32>
    %123 = vector.shape_cast %122 : vector<1x8x128xf32> to vector<8x128xf32>
    %cst_68 = arith.constant dense<0.000000e+00> : vector<2x128xf32>
    %124 = tpu.matmul %121, %123, %cst_68 {dimension_numbers = #tpu.dot_dimension_numbers<[1], [0], [0], [1], [0, 0, 1, 1], [], []>} : vector<2x8xf32>, vector<8x128xf32>, vector<2x128xf32> -> vector<2x128xf32>
    %125 = arith.addf %119, %124 : vector<2x128xf32>
    %126 = vector.extract_strided_slice %16 {offsets = [0, 18, 0], sizes = [2, 1, 8], strides = [1, 1, 1]} : vector<2x24x8xf32> to vector<2x1x8xf32>
    %127 = vector.shape_cast %126 : vector<2x1x8xf32> to vector<2x8xf32>
    %c18 = arith.constant 18 : index
    %c0_69 = arith.constant 0 : index
    %c0_70 = arith.constant 0 : index
    %128 = vector.load %arg6[%c18, %c0_69, %c0_70] : memref<24x8x128xf32, #tpu.memory_space<vmem>>, vector<1x8x128xf32>
    %129 = vector.shape_cast %128 : vector<1x8x128xf32> to vector<8x128xf32>
    %cst_71 = arith.constant dense<0.000000e+00> : vector<2x128xf32>
    %130 = tpu.matmul %127, %129, %cst_71 {dimension_numbers = #tpu.dot_dimension_numbers<[1], [0], [0], [1], [0, 0, 1, 1], [], []>} : vector<2x8xf32>, vector<8x128xf32>, vector<2x128xf32> -> vector<2x128xf32>
    %131 = arith.addf %125, %130 : vector<2x128xf32>
    %132 = vector.extract_strided_slice %16 {offsets = [0, 19, 0], sizes = [2, 1, 8], strides = [1, 1, 1]} : vector<2x24x8xf32> to vector<2x1x8xf32>
    %133 = vector.shape_cast %132 : vector<2x1x8xf32> to vector<2x8xf32>
    %c19 = arith.constant 19 : index
    %c0_72 = arith.constant 0 : index
    %c0_73 = arith.constant 0 : index
    %134 = vector.load %arg6[%c19, %c0_72, %c0_73] : memref<24x8x128xf32, #tpu.memory_space<vmem>>, vector<1x8x128xf32>
    %135 = vector.shape_cast %134 : vector<1x8x128xf32> to vector<8x128xf32>
    %cst_74 = arith.constant dense<0.000000e+00> : vector<2x128xf32>
    %136 = tpu.matmul %133, %135, %cst_74 {dimension_numbers = #tpu.dot_dimension_numbers<[1], [0], [0], [1], [0, 0, 1, 1], [], []>} : vector<2x8xf32>, vector<8x128xf32>, vector<2x128xf32> -> vector<2x128xf32>
    %137 = arith.addf %131, %136 : vector<2x128xf32>
    %138 = vector.extract_strided_slice %16 {offsets = [0, 20, 0], sizes = [2, 1, 8], strides = [1, 1, 1]} : vector<2x24x8xf32> to vector<2x1x8xf32>
    %139 = vector.shape_cast %138 : vector<2x1x8xf32> to vector<2x8xf32>
    %c20 = arith.constant 20 : index
    %c0_75 = arith.constant 0 : index
    %c0_76 = arith.constant 0 : index
    %140 = vector.load %arg6[%c20, %c0_75, %c0_76] : memref<24x8x128xf32, #tpu.memory_space<vmem>>, vector<1x8x128xf32>
    %141 = vector.shape_cast %140 : vector<1x8x128xf32> to vector<8x128xf32>
    %cst_77 = arith.constant dense<0.000000e+00> : vector<2x128xf32>
    %142 = tpu.matmul %139, %141, %cst_77 {dimension_numbers = #tpu.dot_dimension_numbers<[1], [0], [0], [1], [0, 0, 1, 1], [], []>} : vector<2x8xf32>, vector<8x128xf32>, vector<2x128xf32> -> vector<2x128xf32>
    %143 = arith.addf %137, %142 : vector<2x128xf32>
    %144 = vector.extract_strided_slice %16 {offsets = [0, 21, 0], sizes = [2, 1, 8], strides = [1, 1, 1]} : vector<2x24x8xf32> to vector<2x1x8xf32>
    %145 = vector.shape_cast %144 : vector<2x1x8xf32> to vector<2x8xf32>
    %c21 = arith.constant 21 : index
    %c0_78 = arith.constant 0 : index
    %c0_79 = arith.constant 0 : index
    %146 = vector.load %arg6[%c21, %c0_78, %c0_79] : memref<24x8x128xf32, #tpu.memory_space<vmem>>, vector<1x8x128xf32>
    %147 = vector.shape_cast %146 : vector<1x8x128xf32> to vector<8x128xf32>
    %cst_80 = arith.constant dense<0.000000e+00> : vector<2x128xf32>
    %148 = tpu.matmul %145, %147, %cst_80 {dimension_numbers = #tpu.dot_dimension_numbers<[1], [0], [0], [1], [0, 0, 1, 1], [], []>} : vector<2x8xf32>, vector<8x128xf32>, vector<2x128xf32> -> vector<2x128xf32>
    %149 = arith.addf %143, %148 : vector<2x128xf32>
    %150 = vector.extract_strided_slice %16 {offsets = [0, 22, 0], sizes = [2, 1, 8], strides = [1, 1, 1]} : vector<2x24x8xf32> to vector<2x1x8xf32>
    %151 = vector.shape_cast %150 : vector<2x1x8xf32> to vector<2x8xf32>
    %c22 = arith.constant 22 : index
    %c0_81 = arith.constant 0 : index
    %c0_82 = arith.constant 0 : index
    %152 = vector.load %arg6[%c22, %c0_81, %c0_82] : memref<24x8x128xf32, #tpu.memory_space<vmem>>, vector<1x8x128xf32>
    %153 = vector.shape_cast %152 : vector<1x8x128xf32> to vector<8x128xf32>
    %cst_83 = arith.constant dense<0.000000e+00> : vector<2x128xf32>
    %154 = tpu.matmul %151, %153, %cst_83 {dimension_numbers = #tpu.dot_dimension_numbers<[1], [0], [0], [1], [0, 0, 1, 1], [], []>} : vector<2x8xf32>, vector<8x128xf32>, vector<2x128xf32> -> vector<2x128xf32>
    %155 = arith.addf %149, %154 : vector<2x128xf32>
    %156 = vector.extract_strided_slice %16 {offsets = [0, 23, 0], sizes = [2, 1, 8], strides = [1, 1, 1]} : vector<2x24x8xf32> to vector<2x1x8xf32>
    %157 = vector.shape_cast %156 : vector<2x1x8xf32> to vector<2x8xf32>
    %c23 = arith.constant 23 : index
    %c0_84 = arith.constant 0 : index
    %c0_85 = arith.constant 0 : index
    %158 = vector.load %arg6[%c23, %c0_84, %c0_85] : memref<24x8x128xf32, #tpu.memory_space<vmem>>, vector<1x8x128xf32>
    %159 = vector.shape_cast %158 : vector<1x8x128xf32> to vector<8x128xf32>
    %cst_86 = arith.constant dense<0.000000e+00> : vector<2x128xf32>
    %160 = tpu.matmul %157, %159, %cst_86 {dimension_numbers = #tpu.dot_dimension_numbers<[1], [0], [0], [1], [0, 0, 1, 1], [], []>} : vector<2x8xf32>, vector<8x128xf32>, vector<2x128xf32> -> vector<2x128xf32>
    %161 = arith.addf %155, %160 : vector<2x128xf32>
    %c0_87 = arith.constant 0 : index
    %c0_88 = arith.constant 0 : index
    %162 = vector.load %arg7[%c0_87, %c0_88] : memref<1x128xf32, #tpu.memory_space<vmem>>, vector<1x128xf32>
    %163 = vector.broadcast %162 : vector<1x128xf32> to vector<2x128xf32>
    %164 = arith.addf %161, %163 : vector<2x128xf32>
    %cst_89 = arith.constant 0.000000e+00 : f32
    %165 = vector.broadcast %cst_89 : f32 to vector<2x128xf32>
    %166 = arith.maximumf %164, %165 : vector<2x128xf32>
    %c0_90 = arith.constant 0 : index
    %c0_91 = arith.constant 0 : index
    %167 = vector.load %arg8[%c0_90, %c0_91] : memref<128x8xf32, #tpu.memory_space<vmem>>, vector<128x8xf32>
    %cst_92 = arith.constant dense<0.000000e+00> : vector<2x8xf32>
    %168 = tpu.matmul %166, %167, %cst_92 {dimension_numbers = #tpu.dot_dimension_numbers<[1], [0], [0], [1], [0, 0, 1, 1], [], []>} : vector<2x128xf32>, vector<128x8xf32>, vector<2x8xf32> -> vector<2x8xf32>
    %c0_93 = arith.constant 0 : index
    %c0_94 = arith.constant 0 : index
    %169 = vector.load %arg9[%c0_93, %c0_94] : memref<1x8xf32, #tpu.memory_space<vmem>>, vector<1x8xf32>
    %170 = vector.broadcast %169 : vector<1x8xf32> to vector<2x8xf32>
    %171 = arith.addf %168, %170 : vector<2x8xf32>
    %c0_95 = arith.constant 0 : index
    %c0_96 = arith.constant 0 : index
    %172 = vector.load %arg10[%c0_95, %c0_96] : memref<2x8xf32, #tpu.memory_space<vmem>>, vector<2x8xf32>
    tpu.vector_store %arg10[%c0_95, %c0_96], %171 {strides = array<i32>} : memref<2x8xf32, #tpu.memory_space<vmem>>, vector<2x8xf32>,
    return
  }
  func.func @transform_0(%arg0: i32) -> (i32, i32, i32) {
    %c0_i32 = arith.constant 0 : i32
    %c0_i32_0 = arith.constant 0 : i32
    %c0_i32_1 = arith.constant 0 : i32
    return %arg0, %c0_i32, %c0_i32_0 : i32, i32, i32
  }
  func.func @transform_1(%arg0: i32) -> (i32, i32) {
    %c0_i32 = arith.constant 0 : i32
    %c0_i32_0 = arith.constant 0 : i32
    %c0_i32_1 = arith.constant 0 : i32
    return %c0_i32, %c0_i32_0 : i32, i32
  }
  func.func @transform_2(%arg0: i32) -> (i32, i32) {
    %c0_i32 = arith.constant 0 : i32
    %c0_i32_0 = arith.constant 0 : i32
    %c0_i32_1 = arith.constant 0 : i32
    return %c0_i32, %c0_i32_0 : i32, i32
  }
  func.func @transform_3(%arg0: i32) -> (i32, i32) {
    %c0_i32 = arith.constant 0 : i32
    %c0_i32_0 = arith.constant 0 : i32
    %c0_i32_1 = arith.constant 0 : i32
    return %c0_i32, %c0_i32_0 : i32, i32
  }
  func.func @transform_4(%arg0: i32) -> (i32, i32) {
    %c0_i32 = arith.constant 0 : i32
    %c0_i32_0 = arith.constant 0 : i32
    %c0_i32_1 = arith.constant 0 : i32
    return %c0_i32, %c0_i32_0 : i32, i32
  }
  func.func @transform_5(%arg0: i32) -> (i32, i32, i32) {
    %c0_i32 = arith.constant 0 : i32
    %c0_i32_0 = arith.constant 0 : i32
    %c0_i32_1 = arith.constant 0 : i32
    %c0_i32_2 = arith.constant 0 : i32
    return %c0_i32, %c0_i32_0, %c0_i32_1 : i32, i32, i32
  }
  func.func @transform_6(%arg0: i32) -> (i32, i32) {
    %c0_i32 = arith.constant 0 : i32
    %c0_i32_0 = arith.constant 0 : i32
    %c0_i32_1 = arith.constant 0 : i32
    return %c0_i32, %c0_i32_0 : i32, i32
  }
  func.func @transform_7(%arg0: i32) -> (i32, i32) {
    %c0_i32 = arith.constant 0 : i32
    %c0_i32_0 = arith.constant 0 : i32
    %c0_i32_1 = arith.constant 0 : i32
    return %c0_i32, %c0_i32_0 : i32, i32
  }
  func.func @transform_8(%arg0: i32) -> (i32, i32) {
    %c0_i32 = arith.constant 0 : i32
    %c0_i32_0 = arith.constant 0 : i32
    %c0_i32_1 = arith.constant 0 : i32
    return %c0_i32, %c0_i32_0 : i32, i32
  }
  func.func @transform_9(%arg0: i32) -> (i32, i32) {
    %c0_i32 = arith.constant 0 : i32
    %c0_i32_0 = arith.constant 0 : i32
    return %arg0, %c0_i32 : i32, i32
  }
}

</mosaic_0001>

<bundles_post_ra>
// kernel: qnet_forward.1
= control target key start
LH: loop header
LB: loop body
LE: loop exit
PB: predicated region body
PF: predicated region fallthrough
CT: control target
= control target key end

     0   :  { %v2735_v3 = vmov 0.0|0.0   ;;  %vm70_vm0 = vcmask 130048   ;;  %s3282_s0 = inlined_call_operand.vmem [shape: f32[2,24,144], index: 0, kind: input, shape index: {}]   ;;  %s3283_s1 = inlined_call_operand.vmem [shape: f32[144,72], index: 1, kind: input, shape index: {}]   ;;  %s3284_s2 = inlined_call_operand.vmem [shape: f32[1,72], index: 2, kind: input, shape index: {}]   ;;  %s3285_s3 = inlined_call_operand.vmem [shape: f32[72,8], index: 3, kind: input, shape index: {}]   ;;  %s3286_s4 = inlined_call_operand.vmem [shape: f32[1,8], index: 4, kind: input, shape index: {}]   ;;  %s3287_s5 = inlined_call_operand.vmem [shape: f32[24,8,128], index: 5, kind: input, shape index: {}]   ;;  %s3288_s6 = inlined_call_operand.vmem [shape: f32[1,128], index: 6, kind: input, shape index: {}]   ;;  %s3289_s7 = inlined_call_operand.vmem [shape: f32[128,8], index: 7, kind: input, shape index: {}]   ;;  %s3290_s8 = inlined_call_operand.vmem [shape: f32[1,8], index: 8, kind: input, shape index: {}]   ;;  %s3291_s9 = inlined_call_operand.hbm [shape: f32[2,8], index: 9, kind: output, shape index: {}]  }
   0x1   :  { %v45_v0 = vld [vmem:[%s3283_s1] sm:$0xff]  ;;  %v46_v1 = vld [vmem:[%s3283_s1 + $0x8] sm:$0xff]  ;;  %v47_v2 = vld [vmem:[%s3283_s1 + $0x10] sm:$0xff]  ;;  %2640 = vmatprep.subr.bf16.mxu0 %v2735_v3 }
   0x2   :  { %v2641_v4 = vpack.c.bf16 %v46_v1, %v45_v0  ;;  %v48_v5 = vld [vmem:[%s3283_s1 + $0x18] sm:$0xff]  ;;  %v49_v7 = vld [vmem:[%s3283_s1 + $0x20] sm:$0xff]  ;;  %v50_v8 = vld [vmem:[%s3283_s1 + $0x28] sm:$0xff] }
   0x3   :  { %v2644_v6 = vpack.c.bf16 %v48_v5, %v47_v2  ;;  %v34_v9 = vld [vmem:[%s3282_s0 + $0x8] sm:$0xff]  ;;  %v2647_v10 = vpack.c.bf16 %v50_v8, %v49_v7  ;;  %v51_v11 = vld [vmem:[%s3283_s1 + $0x30] sm:$0xff]  ;;  %v52_v12 = vld [vmem:[%s3283_s1 + $0x38] sm:$0xff] }
   0x4   :  { %2642 = vmatpush1.bf16.msra.mxu0 %v2641_v4  ;;  %2316 = vmatprep.mubr.msk.f32.mxu0 %vm70_vm0, %v34_v9  ;;  %v190_v13 = vld [vmem:[%s3285_s3] sm:$0xff]  ;;  %v191_v14 = vld [vmem:[%s3285_s3 + $0x8] sm:$0xff]  ;;  %v192_v15 = vld [vmem:[%s3285_s3 + $0x10] sm:$0xff]  ;;  %v2650_v16 = vpack.c.bf16 %v52_v12, %v51_v11 }
   0x5   :  { %2643 = vmatprep.subr.bf16.mxu0 %v2735_v3  ;;  %v53_v17 = vld [vmem:[%s3283_s1 + $0x40] sm:$0xff]  ;;  %v54_v18 = vld [vmem:[%s3283_s1 + $0x48] sm:$0xff]  ;;  %v2667_v19 = vpack.c.bf16 %v191_v14, %v190_v13  ;;  %v193_v20 = vld [vmem:[%s3285_s3 + $0x18] sm:$0xff] }
   0x6   :  { %v2671_v21 = vpack.c.bf16 %v193_v20, %v192_v15  ;;  %v194_v22 = vld [vmem:[%s3285_s3 + $0x20] sm:$0xff]  ;;  %v195_v23 = vld [vmem:[%s3285_s3 + $0x28] sm:$0xff] }
   0x8   :  { %2645 = vmatpush1.bf16.msra.mxu0 %v2644_v6 }
   0x9   :  { %2646 = vmatprep.subr.bf16.mxu0 %v2735_v3 }
   0xc   :  { %2648 = vmatpush1.bf16.msra.mxu0 %v2647_v10 }
   0xd   :  { %2649 = vmatprep.subr.bf16.mxu0 %v2735_v3 }
   0xe   :  { %14 = vsyncpa [#allocation3], 0  ;;  %2668 = vmatprep.subr.bf16.mxu1 %v2667_v19  ;;  %v2653_v24 = vpack.c.bf16 %v54_v18, %v53_v17  ;;  %v2675_v25 = vpack.c.bf16 %v195_v23, %v194_v22  ;;  %v55_v26 = vld [vmem:[%s3283_s1 + $0x50] sm:$0xff]  ;;  %v56_v27 = vld [vmem:[%s3283_s1 + $0x58] sm:$0xff]  ;;  %vm206_vm1 = vcmask 588800   ;;  %vm2737_vm2 = vmmov 0  }
   0xf   :  { %2670 = vmatpush3.bf16.msra.mxu1 %v2667_v19  ;;  %v2656_v28 = vpack.c.bf16 %v56_v27, %v55_v26  ;;  %v57_v29 = vld [vmem:[%s3283_s1 + $0x60] sm:$0xff]  ;;  %v58_v30 = vld [vmem:[%s3283_s1 + $0x68] sm:$0xff]  ;;  %v59_v32 = vld [vmem:[%s3283_s1 + $0x70] sm:$0xff]  ;;  %vm332_vm3 = vcmask 1041409   ;;  %vm334_vm4 = vcmask 64512   ;;  %s2738_s26 = smov [#allocation2]  }
  0x10   :  { %2651 = vmatpush1.bf16.msra.mxu0 %v2650_v16  ;;  %2672 = vmatprep.subr.bf16.mxu1 %v2671_v21  ;;  %v2659_v31 = vpack.c.bf16 %v58_v30, %v57_v29  ;;  %v60_v33 = vld [vmem:[%s3283_s1 + $0x78] sm:$0xff]  ;;  %v61_v35 = vld [vmem:[%s3283_s1 + $0x80] sm:$0xff]  ;;  %v62_v36 = vld [vmem:[%s3283_s1 + $0x88] sm:$0xff]  ;;  %v2736_v16 = vmov 0.0   ;;  %vm2299_vm5 = vcmask 58368  }
  0x11   :  { %2652 = vmatprep.subr.bf16.mxu0 %v2735_v3  ;;  %v2662_v34 = vpack.c.bf16 %v60_v33, %v59_v32  ;;  %v2665_v37 = vpack.c.bf16 %v62_v36, %v61_v35  ;;  %v33_v38 = vld [vmem:[%s3282_s0] sm:$0xff]  ;;  %v36_v39 = vld [vmem:[%s3282_s0 + $0x18] sm:$0xff]  ;;  %v35_v40 = vld [vmem:[%s3282_s0 + $0x10] sm:$0xff] }
  0x12   :  { %v38_v41 = vld [vmem:[%s3282_s0 + $0x28] sm:$0xff]  ;;  %v37_v42 = vld [vmem:[%s3282_s0 + $0x20] sm:$0xff]  ;;  %v40_v43 = vld [vmem:[%s3282_s0 + $0x38] sm:$0xff] }
  0x13   :  { %2674 = vmatpush3.bf16.msra.mxu1 %v2671_v21  ;;  %v39_v44 = vld [vmem:[%s3282_s0 + $0x30] sm:$0xff]  ;;  %v42_v45 = vld [vmem:[%s3282_s0 + $0x48] sm:$0xff]  ;;  %v41_v46 = vld [vmem:[%s3282_s0 + $0x40] sm:$0xff] }
  0x14   :  { %2654 = vmatpush1.bf16.msra.mxu0 %v2653_v24  ;;  %2676 = vmatprep.subr.bf16.mxu1 %v2675_v25  ;;  %v44_v47 = vld [vmem:[%s3282_s0 + $0x58] sm:$0xff]  ;;  %v43_v48 = vld [vmem:[%s3282_s0 + $0x50] sm:$0xff]  ;;  %v198_v52 = vld [vmem:[%s3285_s3 + $0x40] sm:$0xff] }
  0x15   :  { %2655 = vmatprep.subr.bf16.mxu0 %v2735_v3  ;;  %v196_v49 = vld [vmem:[%s3285_s3 + $0x30] sm:$0xff]  ;;  %v197_v50 = vld [vmem:[%s3285_s3 + $0x38] sm:$0xff]  ;;  %v2315_v53 = vld [vmem:[%s3284_s2] ss:$0 sm:$0xff] }
  0x16   :  { %v2679_v51 = vpack.c.bf16 %v197_v50, %v196_v49  ;;  %v2329_v15 = vld [vmem:[%s3287_s5 + $0x8] sm:$0xff]  ;;  %v2360_v17 = vld [vmem:[%s3287_s5 + $0x80] sm:$0xff] }
  0x17   :  { %2678 = vmatpush3.bf16.msra.mxu1 %v2675_v25  ;;  %v2322_v18 = vld [vmem:[%s3286_s4] ss:$0 sm:$0xff]  ;;  %s2307_s4 = sshll.u32 %s2738_s26, 4  ;;  %s2308_s4 = int_to_ptr.vmem [resolvable:$true] %s2307_s4 }
  0x18   :  { %2657 = vmatpush1.bf16.msra.mxu0 %v2656_v28  ;;  %2680 = vmatprep.subr.bf16.mxu1 %v2679_v51  ;;  %s2711_s27 = scalar_lea.vmem %s2308_s4, 32  ;;  %p2716_p1 = scmp.lt.s32.totalorder %s2308_s4, %s2308_s4 }
  0x19   :  { %2658 = vmatprep.subr.bf16.mxu0 %v2735_v3  ;;  %p2712_p0 = scmp.ne.s32.totalorder %s2308_s4, %s2711_s27  ;;  %p2717_p2 = scmp.lt.s32.totalorder %s2711_s27, %s2711_s27 }
  0x1b   :  { %2682 = vmatpush3.bf16.msra.mxu1 %v2679_v51  ;;  %p2718_p3 = por %p2717_p2, %p2716_p1 }
  0x1c   :  { %2660 = vmatpush1.bf16.msra.mxu0 %v2659_v31  ;;  %2474 = vmatprep.subr.mxu1 %v198_v52 }
  0x1d   :  { %2661 = vmatprep.subr.bf16.mxu0 %v2735_v3  ;;  %p2719_p4 = pnand %p2718_p3, %p2712_p0 }
  0x1f   :  { %2475 = vmatpush3.msra.mxu1 %v198_v52  ;;  %v2332_v52 = vld [vmem:[%s3287_s5 + $0x10] sm:$0xff] }
  0x20   :  { %2663 = vmatpush1.bf16.msra.mxu0 %v2662_v34  ;;  %2485 = vmatprep.subr.mxu1 %v2736_v16  ;;  %v326_v34 = vld [vmem:[%s3287_s5] sm:$0xff] }
  0x21   :  { %2664 = vmatprep.subr.bf16.mxu0 %v2735_v3 }
  0x24   :  { %2666 = vmatpush1.bf16.msra.mxu0 %v2665_v37 }
  0x25   :  { %2565 = vmatprep.subr.mxu0 %v2736_v16 }
  0x27   :  { %154 = vmatmul.mubr.f32.vlgmr.msra.gmra.mrb[0].mxu0 %v33_v38 }
  0x28   :  { %2317 = vmatprep.mubr.msk.f32.mxu0 %vm70_vm0, %v36_v39  ;;  %2566 = vmatpush3.msra.mxu0 %v2360_v17  ;;  %v2364_v17 = vld [vmem:[%s3287_s5 + $0x90] sm:$0xff] }
  0x29   :  { %2575 = vmatprep.subr.mxu0 %v2736_v16 }
  0x2b   :  { %159 = vmatmul.mubr.f32.gmra.mrb[2].mxu0 %v35_v40 }
  0x2c   :  { %2318 = vmatprep.mubr.msk.f32.mxu0 %vm70_vm0, %v38_v41 }
  0x2f   :  { %164 = vmatmul.mubr.f32.gmra.mrb[4].mxu0 %v37_v42 }
  0x30   :  { %2319 = vmatprep.mubr.msk.f32.mxu0 %vm70_vm0, %v40_v43 }
  0x33   :  { %169 = vmatmul.mubr.f32.gmra.mrb[6].mxu0 %v39_v44 }
  0x34   :  { %2320 = vmatprep.mubr.msk.f32.mxu0 %vm70_vm0, %v42_v45 }
  0x37   :  { %174 = vmatmul.mubr.f32.gmra.mrb[8].mxu0 %v41_v46 }
  0x38   :  { %2321 = vmatprep.mubr.msk.f32.mxu0 %vm70_vm0, %v44_v47 }
  0x3b   :  { %179 = vmatmul.mubr.f32.gmra.mrb[10].mxu0 %v43_v48 }
  0x3c   :  { %2567 = vmatprep.mubr.msk.f32.mxu0 %vm2737_vm2, %v2736_v16 }
  0xfa   :  { %v155_v54 = vpop.f32.mrb[0].mxu0 }
  0xfb   :  { %v156_v55 = vadd.f32 %v2315_v53, %v155_v54  ;;  %v157_v56 = vpop.f32.mrb[1].mxu0 }
  0xfd   :  { %v184_v57 = vmax.f32 %v156_v55, 0.0 }
  0xfe   :  { %v160_v58 = vpop.f32.mrb[2].mxu0 }
  0xff   :  { %v161_v59 = vadd.f32 %v2315_v53, %v160_v58  ;;  %v162_v60 = vpop.f32.mrb[3].mxu0  ;;  %2476 = vmatprep.mubr.msk.f32.mxu1 %vm206_vm1, %v184_v57 }
 0x101   :  { %v185_v61 = vmax.f32 %v161_v59, 0.0 }
 0x102   :  { %v165_v62 = vpop.f32.mrb[4].mxu0 }
 0x103   :  { %v166_v63 = vadd.f32 %v2315_v53, %v165_v62  ;;  %v167_v0 = vpop.f32.mrb[5].mxu0  ;;  %2477 = vmatmul.mubr.msk.f32.vlgmr.msra.gmra.mrb[0].mxu1 %vm206_vm1, %v185_v61 }
 0x104   :  { %2486 = vmatpush3.msra.mxu1 %v2329_v15 }
 0x105   :  { %v186_v1 = vmax.f32 %v166_v63, 0.0  ;;  %2490 = vmatprep.subr.mxu1 %v2736_v16 }
 0x106   :  { %v170_v2 = vpop.f32.mrb[6].mxu0 }
 0x107   :  { %v171_v4 = vadd.f32 %v2315_v53, %v170_v2  ;;  %v172_v5 = vpop.f32.mrb[7].mxu0  ;;  %2479 = vmatprep.mubr.msk.f32.mxu1 %vm206_vm1, %v186_v1 }
 0x109   :  { %v187_v6 = vmax.f32 %v171_v4, 0.0 }
 0x10a   :  { %v175_v7 = vpop.f32.mrb[8].mxu0 }
 0x10b   :  { %2480 = vmatmul.mubr.msk.f32.gmra.mrb[2].mxu1 %vm206_vm1, %v187_v6  ;;  %v176_v8 = vadd.f32 %v2315_v53, %v175_v7  ;;  %v177_v9 = vpop.f32.mrb[9].mxu0 }
 0x10d   :  { %v188_v10 = vmax.f32 %v176_v8, 0.0  ;;  %v2334_v8 = vld [vmem:[%s3287_s5 + $0x18] sm:$0xff] }
 0x10e   :  { %v180_v11 = vpop.f32.mrb[10].mxu0 }
 0x10f   :  { %v181_v12 = vadd.f32 %v2315_v53, %v180_v11  ;;  %2482 = vmatprep.mubr.msk.f32.mxu1 %vm206_vm1, %v188_v10  ;;  %v182_v13 = vpop.f32.mrb[11].mxu0 }
 0x111   :  { %v189_v14 = vmax.f32 %v181_v12, 0.0 }
 0x113   :  { %2483 = vmatmul.mubr.msk.f32.gmra.mrb[4].mxu1 %vm206_vm1, %v189_v14 }
 0x114   :  { %2487 = vmatprep.mubr.msk.f32.mxu1 %vm2737_vm2, %v2736_v16 }
 0x1d6   :  { %v2478_v19 = vpop.f32.mrb[0].mxu1 }
 0x1d7   :  { %v291_v20 = vpop.f32.mrb[1].mxu1  ;;  %v297_v21 = vadd.f32 %v2478_v19, %v2322_v18 }
 0x1d8   :  { %v292_v22 = vadd.f32 %v2322_v18, %v291_v20 }
 0x1d9   :  { %v2947_v23 = vmax.f32 %v297_v21, 0.0 }
 0x1da   :  { %v320_v24 = vmax.f32 %v292_v22, 0.0 }
 0x1db   :  { %v1030_v28 = vrot.slane %v2947_v23, 1  ;;  %v1107_v29 = vrot.slane %v2947_v23, 2  ;;  %v1185_v33 = vrot.slane %v2947_v23, 3  ;;  %v1263_v59 = vrot.slane %v2947_v23, 4 }
 0x1dc   :  { %v331_v32 = vrot.slane %v320_v24, 1  ;;  %v483_v35 = vrot.slane %v320_v24, 2  ;;  %v561_v36 = vrot.slane %v320_v24, 3  ;;  %v639_v37 = vrot.slane %v320_v24, 4 }
 0x1dd   :  { %v717_v38 = vrot.slane %v320_v24, 5  ;;  %v795_v45 = vrot.slane %v320_v24, 6  ;;  %v873_v46 = vrot.slane %v320_v24, 7  ;;  %v1341_v60 = vrot.slane %v2947_v23, 5 }
 0x1de   :  { %v2481_v25 = vpop.f32.mrb[2].mxu1  ;;  %v1419_v61 = vrot.slane %v2947_v23, 6  ;;  %v1497_v1 = vrot.slane %v2947_v23, 7 }
 0x1df   :  { %v307_v26 = vadd.f32 %v2481_v25, %v2322_v18  ;;  %v301_v27 = vpop.f32.mrb[3].mxu1 }
 0x1e0   :  { %v302_v31 = vadd.f32 %v2322_v18, %v301_v27  ;;  %v2336_v27 = vld [vmem:[%s3287_s5 + $0x20] sm:$0xff] }
 0x1e1   :  { %v323_v30 = vmax.f32 %v307_v26, 0.0 }
 0x1e2   :  { %v2957_v47 = vmax.f32 %v302_v31, 0.0 }
 0x1e3   :  { %v333_v39 = vsel %vm332_vm3, %v323_v30, %v331_v32  ;;  %v407_v40 = vrot.slane %v323_v30, 7  ;;  %v484_v41 = vrot.slane %v323_v30, 1  ;;  %v562_v42 = vrot.slane %v323_v30, 2 }
 0x1e4   :  { %2488 = vmatmul.mubr.msk.f32.vlgmr.msra.gmra.mrb[6].mxu1 %vm334_vm4, %v333_v39  ;;  %v640_v43 = vrot.slane %v323_v30, 3  ;;  %v718_v44 = vrot.slane %v323_v30, 4  ;;  %v796_v55 = vrot.slane %v323_v30, 5  ;;  %v874_v56 = vrot.slane %v323_v30, 6 }
 0x1e5   :  { %2491 = vmatpush3.msra.mxu1 %v326_v34  ;;  %2492 = vmatprep.mubr.msk.f32.mxu1 %vm2737_vm2, %v2736_v16  ;;  %v408_v48 = vsel %vm332_vm3, %v407_v40, %v320_v24  ;;  %v485_v49 = vsel %vm332_vm3, %v484_v41, %v483_v35  ;;  %v563_v50 = vsel %vm332_vm3, %v562_v42, %v561_v36  ;;  %v1731_v4 = vrot.slane %v2957_v47, 2 }
 0x1e6   :  { %v2484_v51 = vpop.f32.mrb[4].mxu1  ;;  %2495 = vmatprep.subr.mxu1 %v2736_v16  ;;  %v2969_v53 = vsel %vm332_vm3, %v640_v43, %v639_v37  ;;  %v2972_v54 = vsel %vm332_vm3, %v718_v44, %v717_v38  ;;  %v2979_v63 = vsel %vm332_vm3, %v796_v55, %v795_v45  ;;  %v2982_v0 = vsel %vm332_vm3, %v874_v56, %v873_v46  ;;  %v2338_v44 = vld [vmem:[%s3287_s5 + $0x28] sm:$0xff]  ;;  %v2352_v55 = vld [vmem:[%s3287_s5 + $0x60] sm:$0xff] }
 0x1e7   :  { %v317_v57 = vadd.f32 %v2484_v51, %v2322_v18  ;;  %v311_v58 = vpop.f32.mrb[5].mxu1  ;;  %v1887_v5 = vrot.slane %v2957_v47, 4  ;;  %v2043_v6 = vrot.slane %v2957_v47, 6  ;;  %v1654_v9 = vrot.slane %v2957_v47, 1  ;;  %v2344_v51 = vld [vmem:[%s3287_s5 + $0x40] sm:$0xff]  ;;  %v2354_v56 = vld [vmem:[%s3287_s5 + $0x68] sm:$0xff] }
 0x1e8   :  { %v312_v62 = vadd.f32 %v2322_v18, %v311_v58  ;;  %2493 = vmatmul.mubr.msk.f32.vlgmr.msra.gmra.mrb[8].mxu1 %vm334_vm4, %v408_v48  ;;  %v1809_v10 = vrot.slane %v2957_v47, 3  ;;  %v1965_v11 = vrot.slane %v2957_v47, 5  ;;  %v2121_v42 = vrot.slane %v2957_v47, 7  ;;  %v2372_v48 = vld [vmem:[%s3287_s5 + $0xb0] sm:$0xff]  ;;  %v2358_v58 = vld [vmem:[%s3287_s5 + $0x78] sm:$0xff] }
 0x1e9   :  { %v2985_v2 = vmax.f32 %v317_v57, 0.0  ;;  %2496 = vmatpush3.msra.mxu1 %v2332_v52  ;;  %2497 = vmatprep.mubr.msk.f32.mxu1 %vm2737_vm2, %v2736_v16  ;;  %v2346_v52 = vld [vmem:[%s3287_s5 + $0x48] sm:$0xff]  ;;  %v2356_v57 = vld [vmem:[%s3287_s5 + $0x70] sm:$0xff] }
 0x1ea   :  { %v324_v7 = vmax.f32 %v312_v62, 0.0  ;;  %2500 = vmatprep.subr.mxu1 %v2736_v16  ;;  %v2374_v62 = vld [vmem:[%s3287_s5 + $0xb8] sm:$0xff] }
 0x1eb   :  { %v1577_v12 = vrot.slane %v2985_v2, 7  ;;  %v1732_v13 = vrot.slane %v2985_v2, 1  ;;  %v1888_v14 = vrot.slane %v2985_v2, 3  ;;  %v2044_v15 = vrot.slane %v2985_v2, 5 }
 0x1ec   :  { %2498 = vmatmul.mubr.msk.f32.vlgmr.msra.gmra.mrb[10].mxu1 %vm334_vm4, %v485_v49  ;;  %v953_v18 = vrot.slane %v324_v7, 7  ;;  %v3010_v19 = vsel %vm332_vm3, %v324_v7, %v1030_v28  ;;  %v1108_v20 = vrot.slane %v324_v7, 1  ;;  %v1186_v21 = vrot.slane %v324_v7, 2  ;;  %v2340_v49 = vld [vmem:[%s3287_s5 + $0x30] sm:$0xff] }
 0x1ed   :  { %2501 = vmatpush3.msra.mxu1 %v2334_v8  ;;  %v1578_v22 = vsel %vm332_vm3, %v1577_v12, %v2957_v47  ;;  %2502 = vmatprep.mubr.msk.f32.mxu1 %vm2737_vm2, %v2736_v16  ;;  %v1733_v24 = vsel %vm332_vm3, %v1732_v13, %v1731_v4  ;;  %v1889_v25 = vsel %vm332_vm3, %v1888_v14, %v1887_v5  ;;  %v1264_v26 = vrot.slane %v324_v7, 3  ;;  %v2210_v5 = vld [vmem:[%s3289_s7 + $0x20] sm:$0xff]  ;;  %v2212_v8 = vld [vmem:[%s3289_s7 + $0x30] sm:$0xff]  ;;  %v2215_v12 = vld [vmem:[%s3289_s7 + $0x48] sm:$0xff] }
 0x1ee   :  { %2568 = vmatmul.mubr.msk.f32.vlgmr.msra.gmra.mrb[12].mxu0 %vm334_vm4, %v1578_v22  ;;  %2505 = vmatprep.subr.mxu1 %v2736_v16  ;;  %v2045_v28 = vsel %vm332_vm3, %v2044_v15, %v2043_v6  ;;  %v954_v30 = vsel %vm332_vm3, %v953_v18, %v2947_v23  ;;  %v3029_v31 = vsel %vm332_vm3, %v1108_v20, %v1107_v29  ;;  %v1342_v32 = vrot.slane %v324_v7, 4  ;;  %v2368_v29 = vld [vmem:[%s3287_s5 + $0xa0] sm:$0xff]  ;;  %v2211_v6 = vld [vmem:[%s3289_s7 + $0x28] sm:$0xff]  ;;  %v2216_v14 = vld [vmem:[%s3289_s7 + $0x50] sm:$0xff] }
 0x1ef   :  { %2576 = vmatpush3.msra.mxu0 %v2364_v17  ;;  %2577 = vmatprep.mubr.msk.f32.mxu0 %vm2737_vm2, %v2736_v16  ;;  %v3036_v34 = vsel %vm332_vm3, %v1186_v21, %v1185_v33  ;;  %v3039_v35 = vsel %vm332_vm3, %v1264_v26, %v1263_v59  ;;  %v1420_v36 = vrot.slane %v324_v7, 5  ;;  %v1498_v37 = vrot.slane %v324_v7, 6  ;;  %v2362_v59 = vld [vmem:[%s3287_s5 + $0x88] sm:$0xff]  ;;  %v2217_v15 = vld [vmem:[%s3289_s7 + $0x58] sm:$0xff]  ;;  %v2218_v18 = vld [vmem:[%s3289_s7 + $0x60] sm:$0xff] }
 0x1f0   :  { %2503 = vmatmul.mubr.msk.f32.vlgmr.msra.gmra.mrb[12].mxu1 %vm334_vm4, %v563_v50  ;;  %2585 = vmatprep.subr.mxu0 %v2736_v16  ;;  %v3047_v38 = vsel %vm332_vm3, %v1342_v32, %v1341_v60  ;;  %v3051_v23 = vsel %vm332_vm3, %v2985_v2, %v1654_v9  ;;  %v1810_v33 = vrot.slane %v2985_v2, 2  ;;  %v1966_v39 = vrot.slane %v2985_v2, 4  ;;  %v2342_v50 = vld [vmem:[%s3287_s5 + $0x38] sm:$0xff]  ;;  %v2220_v21 = vld [vmem:[%s3289_s7 + $0x70] sm:$0xff] }
 0x1f1   :  { %2506 = vmatpush3.msra.mxu1 %v2336_v27  ;;  %2507 = vmatprep.mubr.msk.f32.mxu1 %vm2737_vm2, %v2736_v16  ;;  %v3058_v40 = vsel %vm332_vm3, %v1420_v36, %v1419_v61  ;;  %v3061_v41 = vsel %vm332_vm3, %v1498_v37, %v1497_v1  ;;  %v2122_v43 = vrot.slane %v2985_v2, 6  ;;  %v2366_v60 = vld [vmem:[%s3287_s5 + $0x98] sm:$0xff]  ;;  %v2370_v61 = vld [vmem:[%s3287_s5 + $0xa8] sm:$0xff]  ;;  %v2208_v2 = vld [vmem:[%s3289_s7 + $0x10] sm:$0xff]  ;;  %v2690_v7 = vpack.c.bf16 %v2211_v6, %v2210_v5 }
 0x1f2   :  { %2578 = vmatmul.mubr.msk.f32.vlgmr.msra.gmra.mrb[14].mxu0 %vm334_vm4, %v1733_v24  ;;  %2510 = vmatprep.subr.mxu1 %v2736_v16  ;;  %v3071_v45 = vsel %vm332_vm3, %v1810_v33, %v1809_v10  ;;  %v3074_v46 = vsel %vm332_vm3, %v1966_v39, %v1965_v11  ;;  %v2213_v9 = vld [vmem:[%s3289_s7 + $0x38] sm:$0xff]  ;;  %v2214_v11 = vld [vmem:[%s3289_s7 + $0x40] sm:$0xff]  ;;  %v2699_v17 = vpack.c.bf16 %v2217_v15, %v2216_v14 }
 0x1f3   :  { %2586 = vmatpush3.msra.mxu0 %v2368_v29  ;;  %2587 = vmatprep.mubr.msk.f32.mxu0 %vm2737_vm2, %v2736_v16  ;;  %v3079_v47 = vsel %vm332_vm3, %v2122_v43, %v2121_v42  ;;  %v2693_v10 = vpack.c.bf16 %v2213_v9, %v2212_v8  ;;  %v2696_v13 = vpack.c.bf16 %v2215_v12, %v2214_v11  ;;  %v2221_v22 = vld [vmem:[%s3289_s7 + $0x78] sm:$0xff] }
 0x1f4   :  { %2508 = vmatmul.mubr.msk.f32.vlgmr.msra.gmra.mrb[14].mxu1 %vm334_vm4, %v2969_v53  ;;  %2595 = vmatprep.subr.mxu0 %v2736_v16  ;;  %v2348_v53 = vld [vmem:[%s3287_s5 + $0x50] sm:$0xff]  ;;  %v2705_v24 = vpack.c.bf16 %v2221_v22, %v2220_v21 }
 0x1f5   :  { %2511 = vmatpush3.msra.mxu1 %v2338_v44  ;;  %2512 = vmatprep.mubr.msk.f32.mxu1 %vm2737_vm2, %v2736_v16 }
 0x1f6   :  { %2588 = vmatmul.mubr.msk.f32.vlgmr.msra.gmra.mrb[16].mxu0 %vm334_vm4, %v1889_v25  ;;  %2515 = vmatprep.subr.mxu1 %v2736_v16 }
 0x1f7   :  { %2596 = vmatpush3.msra.mxu0 %v2372_v48  ;;  %2597 = vmatprep.mubr.msk.f32.mxu0 %vm2737_vm2, %v2736_v16 }
 0x1f8   :  { %2513 = vmatmul.mubr.msk.f32.vlgmr.msra.gmra.mrb[16].mxu1 %vm334_vm4, %v2972_v54  ;;  %2683 = vmatprep.subr.bf16.mxu0 %v2735_v3  ;;  %v2350_v54 = vld [vmem:[%s3287_s5 + $0x58] sm:$0xff] }
 0x1f9   :  { %2516 = vmatpush3.msra.mxu1 %v2340_v49  ;;  %2517 = vmatprep.mubr.msk.f32.mxu1 %vm2737_vm2, %v2736_v16 }
 0x1fa   :  { %2598 = vmatmul.mubr.msk.f32.vlgmr.msra.gmra.mrb[18].mxu0 %vm334_vm4, %v2045_v28  ;;  %2520 = vmatprep.subr.mxu1 %v2736_v16 }
 0x1fb   :  { %2637 = vmatprep.mubr.msk.f32.mxu0 %vm2737_vm2, %v2736_v16 }
 0x1fc   :  { %2518 = vmatmul.mubr.msk.f32.vlgmr.msra.gmra.mrb[18].mxu1 %vm334_vm4, %v2979_v63  ;;  %v2206_v63 = vld [vmem:[%s3289_s7] sm:$0xff] }
 0x1fd   :  { %2521 = vmatpush3.msra.mxu1 %v2342_v50  ;;  %2522 = vmatprep.mubr.msk.f32.mxu1 %vm2737_vm2, %v2736_v16 }
 0x1fe   :  { %2525 = vmatprep.subr.mxu1 %v2736_v16 }
 0x200   :  { %2523 = vmatmul.mubr.msk.f32.vlgmr.msra.gmra.mrb[20].mxu1 %vm334_vm4, %v2982_v0  ;;  %v2207_v0 = vld [vmem:[%s3289_s7 + $0x8] sm:$0xff] }
 0x201   :  { %2526 = vmatpush3.msra.mxu1 %v2344_v51  ;;  %2527 = vmatprep.mubr.msk.f32.mxu1 %vm2737_vm2, %v2736_v16  ;;  %v2684_v1 = vpack.c.bf16 %v2207_v0, %v2206_v63 }
 0x202   :  { %2530 = vmatprep.subr.mxu1 %v2736_v16 }
 0x203   :  { %2685 = vmatpush3.bf16.msra.mxu0 %v2684_v1 }
 0x204   :  { %2528 = vmatmul.mubr.msk.f32.vlgmr.msra.gmra.mrb[22].mxu1 %vm334_vm4, %v954_v30  ;;  %2686 = vmatprep.subr.bf16.mxu0 %v2735_v3 }
 0x205   :  { %2531 = vmatpush3.msra.mxu1 %v2346_v52  ;;  %2532 = vmatprep.mubr.msk.f32.mxu1 %vm2737_vm2, %v2736_v16 }
 0x206   :  { %2535 = vmatprep.subr.mxu1 %v2736_v16 }
 0x208   :  { %2533 = vmatmul.mubr.msk.f32.vlgmr.msra.gmra.mrb[24].mxu1 %vm334_vm4, %v3010_v19  ;;  %v2219_v19 = vld [vmem:[%s3289_s7 + $0x68] sm:$0xff] }
 0x209   :  { %2536 = vmatpush3.msra.mxu1 %v2348_v53  ;;  %2537 = vmatprep.mubr.msk.f32.mxu1 %vm2737_vm2, %v2736_v16  ;;  %v2702_v20 = vpack.c.bf16 %v2219_v19, %v2218_v18 }
 0x20a   :  { %2540 = vmatprep.subr.mxu1 %v2736_v16 }
 0x20c   :  { %2538 = vmatmul.mubr.msk.f32.vlgmr.msra.gmra.mrb[26].mxu1 %vm334_vm4, %v3029_v31 }
 0x20d   :  { %2541 = vmatpush3.msra.mxu1 %v2350_v54  ;;  %2542 = vmatprep.mubr.msk.f32.mxu1 %vm2737_vm2, %v2736_v16 }
 0x20e   :  { %2545 = vmatprep.subr.mxu1 %v2736_v16 }
 0x210   :  { %2543 = vmatmul.mubr.msk.f32.vlgmr.msra.gmra.mrb[28].mxu1 %vm334_vm4, %v3036_v34 }
 0x211   :  { %2546 = vmatpush3.msra.mxu1 %v2352_v55  ;;  %2547 = vmatprep.mubr.msk.f32.mxu1 %vm2737_vm2, %v2736_v16 }
 0x212   :  { %2550 = vmatprep.subr.mxu1 %v2736_v16 }
 0x214   :  { %2548 = vmatmul.mubr.msk.f32.vlgmr.msra.gmra.mrb[30].mxu1 %vm334_vm4, %v3039_v35 }
 0x215   :  { %2551 = vmatpush3.msra.mxu1 %v2354_v56  ;;  %2552 = vmatprep.mubr.msk.f32.mxu1 %vm2737_vm2, %v2736_v16 }
 0x216   :  { %2555 = vmatprep.subr.mxu1 %v2736_v16 }
 0x218   :  { %2553 = vmatmul.mubr.msk.f32.vlgmr.msra.gmra.mrb[32].mxu1 %vm334_vm4, %v3047_v38 }
 0x219   :  { %2556 = vmatpush3.msra.mxu1 %v2356_v57  ;;  %2557 = vmatprep.mubr.msk.f32.mxu1 %vm2737_vm2, %v2736_v16 }
 0x21a   :  { %2560 = vmatprep.subr.mxu1 %v2736_v16 }
 0x21c   :  { %2558 = vmatmul.mubr.msk.f32.vlgmr.msra.gmra.mrb[34].mxu1 %vm334_vm4, %v3058_v40 }
 0x21d   :  { %2561 = vmatpush3.msra.mxu1 %v2358_v58  ;;  %2562 = vmatprep.mubr.msk.f32.mxu1 %vm2737_vm2, %v2736_v16 }
 0x21e   :  { %2570 = vmatprep.subr.mxu1 %v2736_v16 }
 0x220   :  { %2563 = vmatmul.mubr.msk.f32.vlgmr.msra.gmra.mrb[36].mxu1 %vm334_vm4, %v3061_v41 }
 0x221   :  { %2571 = vmatpush3.msra.mxu1 %v2362_v59  ;;  %2572 = vmatprep.mubr.msk.f32.mxu1 %vm2737_vm2, %v2736_v16 }
 0x222   :  { %2580 = vmatprep.subr.mxu1 %v2736_v16 }
 0x224   :  { %2573 = vmatmul.mubr.msk.f32.vlgmr.msra.gmra.mrb[38].mxu1 %vm334_vm4, %v3051_v23 }
 0x225   :  { %2581 = vmatpush3.msra.mxu1 %v2366_v60  ;;  %2582 = vmatprep.mubr.msk.f32.mxu1 %vm2737_vm2, %v2736_v16 }
 0x226   :  { %2590 = vmatprep.subr.mxu1 %v2736_v16 }
 0x228   :  { %2583 = vmatmul.mubr.msk.f32.vlgmr.msra.gmra.mrb[40].mxu1 %vm334_vm4, %v3071_v45 }
 0x229   :  { %2591 = vmatpush3.msra.mxu1 %v2370_v61  ;;  %2592 = vmatprep.mubr.msk.f32.mxu1 %vm2737_vm2, %v2736_v16 }
 0x22a   :  { %2600 = vmatprep.subr.mxu1 %v2736_v16 }
 0x22c   :  { %2593 = vmatmul.mubr.msk.f32.vlgmr.msra.gmra.mrb[42].mxu1 %vm334_vm4, %v3074_v46 }
 0x22d   :  { %2601 = vmatpush3.msra.mxu1 %v2374_v62  ;;  %2602 = vmatprep.mubr.msk.f32.mxu1 %vm2737_vm2, %v2736_v16  ;;  %v2209_v16 = vld [vmem:[%s3289_s7 + $0x18] sm:$0xff] }
 0x22e   :  { %v2687_v4 = vpack.c.bf16 %v2209_v16, %v2208_v2 }
 0x230   :  { %2603 = vmatmul.mubr.msk.f32.vlgmr.msra.gmra.mrb[44].mxu1 %vm334_vm4, %v3079_v47  ;;  %2688 = vmatpush3.bf16.msra.mxu0 %v2687_v4 }
 0x231   :  { %2689 = vmatprep.subr.bf16.mxu0 %v2735_v3 }
 0x234   :  { %2691 = vmatpush3.bf16.msra.mxu0 %v2690_v7 }
 0x235   :  { %2692 = vmatprep.subr.bf16.mxu0 %v2735_v3 }
 0x238   :  { %2694 = vmatpush3.bf16.msra.mxu0 %v2693_v10 }
 0x239   :  { %2695 = vmatprep.subr.bf16.mxu0 %v2735_v3 }
 0x23c   :  { %2697 = vmatpush3.bf16.msra.mxu0 %v2696_v13 }
 0x23d   :  { %2698 = vmatprep.subr.bf16.mxu0 %v2735_v3 }
 0x240   :  { %2700 = vmatpush3.bf16.msra.mxu0 %v2699_v17 }
 0x241   :  { %2701 = vmatprep.subr.bf16.mxu0 %v2735_v3 }
 0x244   :  { %2703 = vmatpush3.bf16.msra.mxu0 %v2702_v20 }
 0x245   :  { %2704 = vmatprep.subr.bf16.mxu0 %v2735_v3 }
 0x248   :  { %2706 = vmatpush3.bf16.msra.mxu0 %v2705_v24 }
 0x2b7   :  { %v403_v25 = vpop.f32.mrb[6].mxu1 }
 0x2b8   :  { %v2489_v26 = vpop.f32.mrb[7].mxu1 }
 0x2bb   :  { %v477_v27 = vpop.f32.mrb[8].mxu1 }
 0x2bc   :  { %v478_v28 = vadd.f32 %v477_v27, %v403_v25  ;;  %v2494_v30 = vpop.f32.mrb[9].mxu1 }
 0x2bf   :  { %v554_v31 = vpop.f32.mrb[10].mxu1 }
 0x2c0   :  { %v558_v32 = vadd.f32 %v554_v31, %v478_v28  ;;  %v2499_v34 = vpop.f32.mrb[11].mxu1  ;;  %v2376_v31 = vld [vmem:[%s3288_s6] ss:$0 sm:$0xff] }
 0x2c1   :  { %v1647_v35 = vpop.f32.mrb[12].mxu0 }
 0x2c2   :  { %v2569_v36 = vpop.f32.mrb[13].mxu0 }
 0x2c3   :  { %v632_v37 = vpop.f32.mrb[12].mxu1 }
 0x2c4   :  { %v636_v29 = vadd.f32 %v632_v37, %v558_v32  ;;  %v2504_v38 = vpop.f32.mrb[13].mxu1  ;;  %v2377_v37 = vld [vmem:[%s3290_s8] ss:$0 sm:$0xff] }
 0x2c5   :  { %v1802_v23 = vpop.f32.mrb[14].mxu0 }
 0x2c6   :  { %v2579_v33 = vpop.f32.mrb[15].mxu0 }
 0x2c7   :  { %v710_v39 = vpop.f32.mrb[14].mxu1 }
 0x2c8   :  { %v714_v40 = vadd.f32 %v710_v39, %v636_v29  ;;  %v2509_v41 = vpop.f32.mrb[15].mxu1 }
 0x2c9   :  { %v1958_v3 = vpop.f32.mrb[16].mxu0 }
 0x2ca   :  { %v2589_v42 = vpop.f32.mrb[17].mxu0 }
 0x2cb   :  { %v788_v43 = vpop.f32.mrb[16].mxu1 }
 0x2cc   :  { %v792_v44 = vadd.f32 %v788_v43, %v714_v40  ;;  %v2514_v45 = vpop.f32.mrb[17].mxu1 }
 0x2cd   :  { %v2114_v46 = vpop.f32.mrb[18].mxu0 }
 0x2ce   :  { %v2599_v47 = vpop.f32.mrb[19].mxu0 }
 0x2cf   :  { %v866_v48 = vpop.f32.mrb[18].mxu1 }
 0x2d0   :  { %v870_v49 = vadd.f32 %v866_v48, %v792_v44  ;;  %v2519_v50 = vpop.f32.mrb[19].mxu1 }
 0x2d3   :  { %v944_v51 = vpop.f32.mrb[20].mxu1 }
 0x2d4   :  { %v948_v52 = vadd.f32 %v944_v51, %v870_v49  ;;  %v2524_v53 = vpop.f32.mrb[21].mxu1 }
 0x2d7   :  { %v1023_v54 = vpop.f32.mrb[22].mxu1 }
 0x2d8   :  { %v1027_v55 = vadd.f32 %v1023_v54, %v948_v52  ;;  %v2529_v56 = vpop.f32.mrb[23].mxu1 }
 0x2db   :  { %v1100_v57 = vpop.f32.mrb[24].mxu1 }
 0x2dc   :  { %v1104_v58 = vadd.f32 %v1100_v57, %v1027_v55  ;;  %v2534_v59 = vpop.f32.mrb[25].mxu1 }
 0x2df   :  { %v1178_v60 = vpop.f32.mrb[26].mxu1 }
 0x2e0   :  { %v1182_v61 = vadd.f32 %v1178_v60, %v1104_v58  ;;  %v2539_v62 = vpop.f32.mrb[27].mxu1 }
 0x2e3   :  { %v1256_v63 = vpop.f32.mrb[28].mxu1 }
 0x2e4   :  { %v1260_v0 = vadd.f32 %v1256_v63, %v1182_v61  ;;  %v2544_v1 = vpop.f32.mrb[29].mxu1 }
 0x2e7   :  { %v1334_v2 = vpop.f32.mrb[30].mxu1 }
 0x2e8   :  { %v1338_v16 = vadd.f32 %v1334_v2, %v1260_v0  ;;  %v2549_v4 = vpop.f32.mrb[31].mxu1 }
 0x2eb   :  { %v1412_v5 = vpop.f32.mrb[32].mxu1 }
 0x2ec   :  { %v1416_v6 = vadd.f32 %v1412_v5, %v1338_v16  ;;  %v2554_v7 = vpop.f32.mrb[33].mxu1 }
 0x2ef   :  { %v1490_v8 = vpop.f32.mrb[34].mxu1 }
 0x2f0   :  { %v1494_v9 = vadd.f32 %v1490_v8, %v1416_v6  ;;  %v2559_v10 = vpop.f32.mrb[35].mxu1 }
 0x2f3   :  { %v1568_v11 = vpop.f32.mrb[36].mxu1 }
 0x2f4   :  { %v1572_v12 = vadd.f32 %v1568_v11, %v1494_v9  ;;  %v2564_v13 = vpop.f32.mrb[37].mxu1 }
 0x2f6   :  { %v1651_v14 = vadd.f32 %v1647_v35, %v1572_v12 }
 0x2f7   :  { %v1724_v15 = vpop.f32.mrb[38].mxu1 }
 0x2f8   :  { %v1728_v17 = vadd.f32 %v1724_v15, %v1651_v14  ;;  %v2574_v18 = vpop.f32.mrb[39].mxu1 }
 0x2fa   :  { %v1806_v19 = vadd.f32 %v1802_v23, %v1728_v17 }
 0x2fb   :  { %v1880_v20 = vpop.f32.mrb[40].mxu1 }
 0x2fc   :  { %v1884_v21 = vadd.f32 %v1880_v20, %v1806_v19  ;;  %v2584_v22 = vpop.f32.mrb[41].mxu1 }
 0x2fe   :  { %v1962_v24 = vadd.f32 %v1958_v3, %v1884_v21 }
 0x2ff   :  { %v2036_v25 = vpop.f32.mrb[42].mxu1 }
 0x300   :  { %v2040_v26 = vadd.f32 %v2036_v25, %v1962_v24  ;;  %v2594_v27 = vpop.f32.mrb[43].mxu1 }
 0x302   :  { %v2118_v28 = vadd.f32 %v2114_v46, %v2040_v26 }
 0x303   :  { %v2192_v30 = vpop.f32.mrb[44].mxu1 }
 0x304   :  { %v2196_v32 = vadd.f32 %v2192_v30, %v2118_v28  ;;  %v2604_v34 = vpop.f32.mrb[45].mxu1 }
 0x306   :  { %v2204_v35 = vadd.f32 %v2376_v31, %v2196_v32 }
 0x308   :  { %v2205_v36 = vmax.f32 %v2204_v35, 0.0 }
 0x30a   :  { %2638 = vmatmul.mubr.f32.vlgmr.msra.gmra.mrb[20].mxu0 %v2205_v36 }
 0x3dd   :  { %v2295_v29 = vpop.f32.mrb[20].mxu0 }
 0x3de   :  { %v2296_v38 = vadd.f32 %v2377_v37, %v2295_v29  ;;  %v2639_v23 = vpop.f32.mrb[21].mxu0 }
 0x3e0   :  { %2300 = vst.msk [vmem:[#allocation2] sm:$0x3] %vm2299_vm5, %v2296_v38 }
 0x3e1   :  { %2722 = shalt.err (!%p2719_p4)
}
 0x3e2   :  { %s2723_s29 = scalar_lea.hbm %s3291_s9, 32 }
 0x3e3   :  { %p2724_p5 = scmp.ne.s32.totalorder %s3291_s9, %s2723_s29  ;;  %p2727_p6 = scmp.lt.u32.totalorder %s2723_s29, %s3291_s9 }
 0x3e5   :  { %p2729_p7 = pnand %p2727_p6, %p2724_p5 }
 0x3e7   :  { %2732 = shalt.err (!%p2729_p7)
}
 0x3e8   :  { %2310 = dma.vmem_to_hbm [thread:$0]  %s2308_s4, 32, %s3291_s9, [#allocation3]  }
 0x3e9   :  { %2733 = dma.done.wait [#allocation3], 32  }
 0x3ea   :  { %2734 = vsyncadd [#allocation3], 4294967264 }
 0x3eb   :  { %2314 = vsyncpa [#allocation3], 1 }

</bundles_post_ra>
